<compile_context>
chip_gen: v6e
topology: v6e:2x2x1
jax: 0.10.0
libtpu: 0.0.40
codegen_flags: <defaults>
</compile_context>

<pallas_src>
import jax
import jax.numpy as jnp
from jax.experimental import pallas as pl
from jax.experimental.pallas import tpu as pltpu


def _head_kernel(x_ref, w1_ref, b1_ref, w2_ref, b2_ref, o_ref):
    # x_ref : [TM, H] (input dtype)  w1_ref: [H, H]  (bf16)  b1_ref: [1, H]  (f32)
    # w2_ref: [H, Lp] (bf16)         b2_ref: [1, Lp] (f32)   o_ref : [TM, Lp]
    x = x_ref[...].astype(w1_ref.dtype)          # bf16 MXU feed (in-register cast)
    h = jnp.dot(x, w1_ref[...], preferred_element_type=jnp.float32) + b1_ref[...]
    h = jnp.tanh(h)                              # f32 activation path
    y = jnp.dot(h.astype(w2_ref.dtype), w2_ref[...],
                preferred_element_type=jnp.float32) + b2_ref[...]
    o_ref[...] = y.astype(o_ref.dtype)


def _round_up(x, m):
    return ((x + m - 1) // m) * m


def _vmem_limit_bytes(tm, h, lp, x_bytes, w_bytes, out_bytes):
    need = (2 * tm * h * x_bytes            # x tile, double-buffered
            + h * h * w_bytes + h * 4       # w1 (single buffer) + b1 (f32)
            + h * lp * w_bytes + lp * 4     # w2 (single buffer) + b2 (f32)
            + 2 * tm * lp * out_bytes       # output tile, double-buffered
            + 2 * tm * max(h, lp) * 4)      # in-kernel f32 temporaries (h, y)
    # ~25% headroom; floor 16 MiB, cap 48 MiB (generation-portable, fits v7x).
    return int(min(max(int(need * 1.25), 16 << 20), 48 << 20))


def model_head(features, w1, b1, w2, b2, *, tile_m=512,
               compute_dtype=jnp.bfloat16, out_dtype=None):
    """features: [B, S, H]. Weights stored as [in, out] (transposed vs torch).
    Returns [B, S, num_labels].

    tile_m should be a multiple of 16; 512 is a safe default on v7x
    (64 MiB VMEM), 1024 is better on v5e/v6e (128 MiB VMEM)."""
    B, S, H = features.shape
    L = w2.shape[1]
    M = B * S
    out_dtype = features.dtype if out_dtype is None else out_dtype

    # Pad only the tiny out_proj params up to a 128-lane-dense output width.
    Lp = _round_up(max(L, 128), 128)
    w1_c = w1.astype(compute_dtype)
    w2_c = jnp.pad(w2, ((0, 0), (0, Lp - L))).astype(compute_dtype)
    b1_c = b1.astype(jnp.float32).reshape(1, H)
    b2_c = jnp.pad(b2, ((0, Lp - L),)).astype(jnp.float32).reshape(1, Lp)

    # Activation is NOT padded or cast in the wrapper (no extra HBM passes).
    x2d = features.reshape(M, H)
    TM = M if M <= tile_m else tile_m      # last tile may be partial
    grid = (pl.cdiv(M, TM),)

    vmem_bytes = _vmem_limit_bytes(
        TM, H, Lp,
        jnp.dtype(features.dtype).itemsize,
        jnp.dtype(compute_dtype).itemsize,
        jnp.dtype(out_dtype).itemsize)

    out = pl.pallas_call(
        _head_kernel,
        out_shape=jax.ShapeDtypeStruct((M, Lp), out_dtype),
        grid_spec=pl.GridSpec(
            grid=grid,
            in_specs=[
                # x tile: pipelined (default double buffering).
                pl.BlockSpec((TM, H), lambda i: (i, 0)),
                # Weights / biases: constant index_map -> VMEM-resident across
                # all M tiles; single buffer (never re-DMA'd) to save VMEM.
                pl.BlockSpec((H, H), lambda i: (0, 0),
                             pipeline_mode=pl.Buffered(1)),
                pl.BlockSpec((1, H), lambda i: (0, 0),
                             pipeline_mode=pl.Buffered(1)),
                pl.BlockSpec((H, Lp), lambda i: (0, 0),
                             pipeline_mode=pl.Buffered(1)),
                pl.BlockSpec((1, Lp), lambda i: (0, 0),
                             pipeline_mode=pl.Buffered(1)),
            ],
            out_specs=pl.BlockSpec((TM, Lp), lambda i: (i, 0)),
        ),
        compiler_params=pltpu.CompilerParams(
            dimension_semantics=("parallel",),   # shard M tiles across TCs (v7x)
            vmem_limit_bytes=vmem_bytes,
        ),
    )(x2d, w1_c, b1_c, w2_c, b2_c)

    # Strip label padding, restore [B, S, L].
    return out[:, :L].reshape(B, S, L)


def _init_params(key, hidden_size, num_labels):
    """Deterministic init mimicking nn.Linear defaults (uniform +-1/sqrt(fan_in)).
    Weights stored as [in_features, out_features] (transposed vs. PyTorch)."""
    k1, k2, k3, k4 = jax.random.split(key, 4)
    bound1 = 1.0 / jnp.sqrt(hidden_size)
    w1 = jax.random.uniform(k1, (hidden_size, hidden_size), jnp.float32,
                            -bound1, bound1)
    b1 = jax.random.uniform(k2, (hidden_size,), jnp.float32, -bound1, bound1)
    w2 = jax.random.uniform(k3, (hidden_size, num_labels), jnp.float32,
                            -bound1, bound1)
    b2 = jax.random.uniform(k4, (num_labels,), jnp.float32, -bound1, bound1)
    return w1, b1, w2, b2


if __name__ == "__main__":
    # Small config consistent with the module: hidden_size=32, num_labels=4.
    batch, seq, hidden, num_labels = 2, 8, 32, 4

    key = jax.random.PRNGKey(0)
    kx, kp = jax.random.split(key)
    features = jax.random.normal(kx, (batch, seq, hidden), jnp.float32)
    w1, b1, w2, b2 = _init_params(kp, hidden, num_labels)

    run = jax.jit(model_head)
    out = jax.block_until_ready(run(features, w1, b1, w2, b2))
    assert out.shape == (batch, seq, num_labels)

    # Reference matching the kernel numerics (bf16 MXU feed, f32 accumulation).
    f32, bf16 = jnp.float32, jnp.bfloat16
    x2d = features.reshape(-1, hidden)
    h_ref = jnp.tanh(jnp.dot(x2d.astype(bf16).astype(f32),
                             w1.astype(bf16).astype(f32)) + b1)
    y_ref = jnp.dot(h_ref.astype(bf16).astype(f32),
                    w2.astype(bf16).astype(f32)) + b2
    ref_bf16 = y_ref.reshape(batch, seq, num_labels)
    assert jnp.allclose(out, ref_bf16, atol=5e-3, rtol=5e-3), (
        float(jnp.max(jnp.abs(out - ref_bf16))))

    # Sanity vs. the exact f32 module forward (looser: bf16 rounding of inputs).
    ref_f32 = jnp.tanh(features @ w1 + b1) @ w2 + b2
    assert jnp.allclose(out, ref_f32, atol=5e-2, rtol=5e-2), (
        float(jnp.max(jnp.abs(out - ref_f32))))

    print("KERNEL_OK")
</pallas_src>

<mosaic_0001>
module attributes {stable_mosaic.version = 11 : i64} {
  func.func @_head_kernel(%arg0: i32, %arg1: memref<16x32xf32, #tpu.memory_space<vmem>>, %arg2: memref<32x32xbf16, #tpu.memory_space<vmem>>, %arg3: memref<1x32xf32, #tpu.memory_space<vmem>>, %arg4: memref<32x128xbf16, #tpu.memory_space<vmem>>, %arg5: memref<1x128xf32, #tpu.memory_space<vmem>>, %arg6: memref<16x128xf32, #tpu.memory_space<vmem>>) attributes {dimension_semantics = [#tpu.dimension_semantics<parallel>], iteration_bounds = array<i64: 1>, scalar_prefetch = 0 : i64, scratch_operands = 0 : i64, tpu.core_type = #tpu.core_type<tc>, window_params = [{transform_indices = @transform_0, window_bounds = array<i64: 16, 32>}, {pipeline_mode = #tpu.pipeline_mode<synchronous>, transform_indices = @transform_1, window_bounds = array<i64: 32, 32>}, {pipeline_mode = #tpu.pipeline_mode<synchronous>, transform_indices = @transform_2, window_bounds = array<i64: 1, 32>}, {pipeline_mode = #tpu.pipeline_mode<synchronous>, transform_indices = @transform_3, window_bounds = array<i64: 32, 128>}, {pipeline_mode = #tpu.pipeline_mode<synchronous>, transform_indices = @transform_4, window_bounds = array<i64: 1, 128>}, {transform_indices = @transform_5, window_bounds = array<i64: 16, 128>}]} {
    %c0 = arith.constant 0 : index
    %c0_0 = arith.constant 0 : index
    %0 = vector.load %arg1[%c0, %c0_0] : memref<16x32xf32, #tpu.memory_space<vmem>>, vector<16x32xf32>
    %1 = arith.truncf %0 : vector<16x32xf32> to vector<16x32xbf16>
    %c0_1 = arith.constant 0 : index
    %c0_2 = arith.constant 0 : index
    %2 = vector.load %arg2[%c0_1, %c0_2] : memref<32x32xbf16, #tpu.memory_space<vmem>>, vector<32x32xbf16>
    %cst = arith.constant dense<0.000000e+00> : vector<16x32xf32>
    %3 = tpu.matmul %1, %2, %cst {dimension_numbers = #tpu.dot_dimension_numbers<[1], [0], [0], [1], [0, 0, 1, 1], [], []>} : vector<16x32xbf16>, vector<32x32xbf16>, vector<16x32xf32> -> vector<16x32xf32>
    %c0_3 = arith.constant 0 : index
    %c0_4 = arith.constant 0 : index
    %4 = vector.load %arg3[%c0_3, %c0_4] : memref<1x32xf32, #tpu.memory_space<vmem>>, vector<1x32xf32>
    %5 = vector.broadcast %4 : vector<1x32xf32> to vector<16x32xf32>
    %6 = arith.addf %3, %5 : vector<16x32xf32>
    %7 = math.tanh %6 : vector<16x32xf32>
    %8 = arith.truncf %7 : vector<16x32xf32> to vector<16x32xbf16>
    %c0_5 = arith.constant 0 : index
    %c0_6 = arith.constant 0 : index
    %9 = vector.load %arg4[%c0_5, %c0_6] : memref<32x128xbf16, #tpu.memory_space<vmem>>, vector<32x128xbf16>
    %cst_7 = arith.constant dense<0.000000e+00> : vector<16x128xf32>
    %10 = tpu.matmul %8, %9, %cst_7 {dimension_numbers = #tpu.dot_dimension_numbers<[1], [0], [0], [1], [0, 0, 1, 1], [], []>} : vector<16x32xbf16>, vector<32x128xbf16>, vector<16x128xf32> -> vector<16x128xf32>
    %c0_8 = arith.constant 0 : index
    %c0_9 = arith.constant 0 : index
    %11 = vector.load %arg5[%c0_8, %c0_9] : memref<1x128xf32, #tpu.memory_space<vmem>>, vector<1x128xf32>
    %12 = vector.broadcast %11 : vector<1x128xf32> to vector<16x128xf32>
    %13 = arith.addf %10, %12 : vector<16x128xf32>
    %c0_10 = arith.constant 0 : index
    %c0_11 = arith.constant 0 : index
    %14 = vector.load %arg6[%c0_10, %c0_11] : memref<16x128xf32, #tpu.memory_space<vmem>>, vector<16x128xf32>
    tpu.vector_store %arg6[%c0_10, %c0_11], %13 {strides = array<i32>} : memref<16x128xf32, #tpu.memory_space<vmem>>, vector<16x128xf32>,
    return
  }
  func.func @transform_0(%arg0: i32) -> (i32, i32) {
    %c0_i32 = arith.constant 0 : i32
    %c0_i32_0 = arith.constant 0 : i32
    return %arg0, %c0_i32 : i32, i32
  }
  func.func @transform_1(%arg0: i32) -> (i32, i32) {
    %c0_i32 = arith.constant 0 : i32
    %c0_i32_0 = arith.constant 0 : i32
    %c0_i32_1 = arith.constant 0 : i32
    return %c0_i32, %c0_i32_0 : i32, i32
  }
  func.func @transform_2(%arg0: i32) -> (i32, i32) {
    %c0_i32 = arith.constant 0 : i32
    %c0_i32_0 = arith.constant 0 : i32
    %c0_i32_1 = arith.constant 0 : i32
    return %c0_i32, %c0_i32_0 : i32, i32
  }
  func.func @transform_3(%arg0: i32) -> (i32, i32) {
    %c0_i32 = arith.constant 0 : i32
    %c0_i32_0 = arith.constant 0 : i32
    %c0_i32_1 = arith.constant 0 : i32
    return %c0_i32, %c0_i32_0 : i32, i32
  }
  func.func @transform_4(%arg0: i32) -> (i32, i32) {
    %c0_i32 = arith.constant 0 : i32
    %c0_i32_0 = arith.constant 0 : i32
    %c0_i32_1 = arith.constant 0 : i32
    return %c0_i32, %c0_i32_0 : i32, i32
  }
  func.func @transform_5(%arg0: i32) -> (i32, i32) {
    %c0_i32 = arith.constant 0 : i32
    %c0_i32_0 = arith.constant 0 : i32
    return %arg0, %c0_i32 : i32, i32
  }
}

</mosaic_0001>

<bundles_post_ra>
// kernel: model_head.1
= control target key start
LH: loop header
LB: loop body
LE: loop exit
PB: predicated region body
PF: predicated region fallthrough
CT: control target
= control target key end

     0   :  { %v208_v0 = vmov 0.0   ;;  %vm209_vm0 = vmmov 0   ;;  %vm47_vm1 = vcmask 261120   ;;  %s272_s1 = inlined_call_operand.vmem [shape: bf16[32,32], index: 1, kind: input, shape index: {}]   ;;  %s273_s0 = inlined_call_operand.vmem [shape: f32[16,32], index: 0, kind: input, shape index: {}]   ;;  %s274_s3 = inlined_call_operand.vmem [shape: bf16[32,128], index: 3, kind: input, shape index: {}]   ;;  %s275_s2 = inlined_call_operand.vmem [shape: f32[1,32], index: 2, kind: input, shape index: {}]   ;;  %s276_s4 = inlined_call_operand.vmem [shape: f32[1,128], index: 4, kind: input, shape index: {}]   ;;  %s277_s5 = inlined_call_operand.vmem [shape: f32[16,128], index: 5, kind: output, shape index: {}]  }
   0x1   :  { %182 = vmatprep.subr.bf16.mxu0 %v208_v0  ;;  %v200_v1 = vld [vmem:[%s272_s1 + $0x8] sm:$0xff]   ;;  %186 = vmatprep.mubr.msk.bf16.mxu0 %vm209_vm0, %v208_v0  ;;  %v201_v2 = vld [vmem:[%s272_s1] sm:$0xff]  }
   0x2   :  { %190 = vmatprep.subr.bf16.mxu1 %v208_v0  ;;  %194 = vmatprep.mubr.msk.bf16.mxu1 %vm209_vm0, %v208_v0  ;;  %v21_v3 = vld [vmem:[%s273_s0] sm:$0xff]  ;;  %v22_v4 = vld [vmem:[%s273_s0 + $0x8] sm:$0xff] }
   0x3   :  { %183 = vmatpush3.bf16.msra.mxu0 %v200_v1  ;;  %v23_v5 = vpack.c.bf16 %v22_v4, %v21_v3  ;;  %v202_v6 = vld [vmem:[%s274_s3 + $0x8] sm:$0xff]   ;;  %v203_v7 = vld [vmem:[%s274_s3] sm:$0xff]  }
   0x4   :  { %184 = vmatprep.subr.bf16.mxu0 %v208_v0  ;;  %191 = vmatpush3.bf16.msra.mxu1 %v202_v6  ;;  %v168_v8 = vld [vmem:[%s275_s2] ss:$0 sm:$0xff] }
   0x5   :  { %192 = vmatprep.subr.bf16.mxu1 %v208_v0  ;;  %v172_v18 = vld [vmem:[%s276_s4] ss:$0 sm:$0xff] }
   0x7   :  { %185 = vmatpush3.bf16.msra.mxu0 %v201_v2 }
   0x8   :  { %193 = vmatpush3.bf16.msra.mxu1 %v203_v7 }
   0xa   :  { %187 = vmatmul.mubr.msk.bf16.vlgmr.msra.gmra.mxu0 %vm47_vm1, %v23_v5 }
  0xca   :  { %v85_v9 = vpop.f32.mrf.mxu0 }
  0xcb   :  { %v86_v10 = vadd.f32 %v168_v8, %v85_v9 }
  0xcc   :  { %v188_v11 = vpop.f32.mrf.mxu0 }
  0xcd   :  { %204 = vtanh.f32 %v86_v10 }
  0xce   :  { %v88_v12 = vpop.f32.mrf.mxu0 }
  0xcf   :  { %v89_v13 = vadd.f32 %v168_v8, %v88_v12 }
  0xd0   :  { %v189_v14 = vpop.f32.mrf.mxu0 }
  0xd1   :  { %206 = vtanh.f32 %v89_v13 }
  0xda   :  { %v205_v15 = vpop.eup %204 }
  0xde   :  { %v207_v16 = vpop.eup %206 }
  0xdf   :  { %v94_v17 = vpack.c.bf16 %v207_v16, %v205_v15 }
  0xe1   :  { %195 = vmatmul.mubr.msk.bf16.vlgmr.msra.gmra.mxu1 %vm47_vm1, %v94_v17 }
 0x1a1   :  { %v155_v19 = vpop.f32.mrf.mxu1 }
 0x1a2   :  { %v156_v20 = vadd.f32 %v172_v18, %v155_v19 }
 0x1a3   :  { %v196_v21 = vpop.f32.mrf.mxu1 }
 0x1a4   :  { %162 = vst [vmem:[%s277_s5] sm:$0xff] %v156_v20 }
 0x1a5   :  { %v158_v22 = vpop.f32.mrf.mxu1 }
 0x1a6   :  { %v159_v23 = vadd.f32 %v172_v18, %v158_v22 }
 0x1a7   :  { %v197_v24 = vpop.f32.mrf.mxu1 }
 0x1a8   :  { %163 = vst [vmem:[%s277_s5 + $0x8] sm:$0xff] %v159_v23 }

</bundles_post_ra>
